<compile_context>
chip_gen: v5e
topology: v5e:2x2
jax: 0.10.0
libtpu: 0.0.40
codegen_flags: <defaults>
</compile_context>

<pallas_src>
import functools

import jax
import jax.numpy as jnp
from jax.experimental import pallas as pl
from jax.experimental.pallas import tpu as pltpu


def _round_up(n, m):
    return ((n + m - 1) // m) * m


def _pick_vmem_limit():
    """Explicit VMEM budget: 3/4 of physical capacity, capped at 96 MiB.

    v5e/v6e have 128 MiB of VMEM per TensorCore, v7x only 64 MiB; the scoped
    default (~32 MiB) is well below that, so raise it explicitly and size the
    blocks against it instead of relying on luck.
    """
    cap = 64 << 20  # conservative default = v7x physical VMEM per TensorCore
    try:
        cap = int(pltpu.get_tpu_info().vmem_capacity_bytes)
    except Exception:
        pass
    return min((cap * 3) // 4, 96 << 20)


# ---------------------------------------------------------------------------
# Path A: fused single-pass kernel (x is read from HBM exactly once).
# ---------------------------------------------------------------------------
def _se_fused_kernel(x_ref, w1_ref, w2_ref, o_ref, *, hw_true, chunk, n_chunks):
    # x_ref / o_ref: (1, C, HW_pad);  w1_ref: (C, Cr);  w2_ref: (Cr, C)
    c = x_ref.shape[1]
    unroll = n_chunks <= 8

    # --- squeeze: chunked global average pool, accumulated in f32 -----------
    # Chunked reads keep live ranges to a few vregs instead of materializing
    # the whole (C, HW) block as a single value (avoids spill pressure).
    def sum_body(i, acc):
        off = pl.multiple_of(i * chunk, chunk)
        xc = x_ref[:, :, pl.ds(off, chunk)].astype(jnp.float32)   # (1, C, chunk)
        return acc + jnp.sum(xc, axis=-1)                          # (1, C)

    sums = jax.lax.fori_loop(0, n_chunks, sum_body,
                             jnp.zeros((1, c), jnp.float32), unroll=unroll)
    y = sums * (1.0 / hw_true)      # mean over the *true* HW (padding is zeros)

    # --- excitation: FC -> ReLU -> FC -> Sigmoid (tiny, off the critical path)
    h = jnp.maximum(
        jnp.dot(y, w1_ref[...], preferred_element_type=jnp.float32), 0.0)
    s = jax.nn.sigmoid(
        jnp.dot(h, w2_ref[...], preferred_element_type=jnp.float32))   # (1, C)

    # --- scale: second chunked sweep over the VMEM-resident block ------------
    def scale_body(i, carry):
        off = pl.multiple_of(i * chunk, chunk)
        xc = x_ref[:, :, pl.ds(off, chunk)].astype(jnp.float32)
        o_ref[:, :, pl.ds(off, chunk)] = (xc * s[:, :, None]).astype(o_ref.dtype)
        return carry

    jax.lax.fori_loop(0, n_chunks, scale_body, 0, unroll=unroll)


def _se_fused_call(x, w1, w2, *, hw_true, vmem_limit):
    B, C, HW_pad = x.shape
    Cr = w1.shape[1]

    chunk = 128
    for cand in (2048, 1024, 512, 256, 128):
        if HW_pad % cand == 0:
            chunk = cand
            break
    n_chunks = HW_pad // chunk

    kernel = functools.partial(_se_fused_kernel, hw_true=hw_true,
                               chunk=chunk, n_chunks=n_chunks)
    return pl.pallas_call(
        kernel,
        out_shape=jax.ShapeDtypeStruct((B, C, HW_pad), x.dtype),
        grid_spec=pltpu.PrefetchScalarGridSpec(
            num_scalar_prefetch=0,
            grid=(B,),
            in_specs=[
                pl.BlockSpec((1, C, HW_pad), lambda b: (b, 0, 0)),
                pl.BlockSpec((C, Cr), lambda b: (0, 0)),
                pl.BlockSpec((Cr, C), lambda b: (0, 0)),
            ],
            out_specs=pl.BlockSpec((1, C, HW_pad), lambda b: (b, 0, 0)),
        ),
        compiler_params=pltpu.CompilerParams(
            dimension_semantics=("parallel",),
            vmem_limit_bytes=vmem_limit),
    )(x, w1, w2)


# ---------------------------------------------------------------------------
# Path B: tiled two-pass fallback (block does not fit the VMEM budget).
# ---------------------------------------------------------------------------
def _se_sum_kernel(x_ref, sum_ref):
    # x_ref: (1, C, tile);  sum_ref: (1, C, 1) f32, resident across the tile axis
    @pl.when(pl.program_id(1) == 0)
    def _():
        sum_ref[...] = jnp.zeros_like(sum_ref)

    xc = x_ref[...].astype(jnp.float32)
    sum_ref[...] += jnp.sum(xc, axis=-1, keepdims=True)


def _se_scale_kernel(x_ref, s_ref, o_ref):
    # x_ref / o_ref: (1, C, tile);  s_ref: (1, C, 1) f32 per-channel scales
    xc = x_ref[...].astype(jnp.float32)
    o_ref[...] = (xc * s_ref[...]).astype(o_ref.dtype)


def _se_tiled_call(x, w1, w2, *, hw_true, vmem_limit, tile_hw=None):
    B, C, HW_pad = x.shape
    itemsize = x.dtype.itemsize

    if tile_hw is None:
        # ~2 MiB per streamed buffer (>=512-lane tiles reach ~85% of the HBM
        # roofline); tile must be a multiple of 128 that divides HW_pad.
        target = max(128, ((2 << 20) // (C * itemsize)) // 128 * 128)
        m = HW_pad // 128
        d_best = 1
        for d in range(m, 0, -1):
            if m % d == 0 and 128 * d <= target:
                d_best = d
                break
        tile = 128 * d_best
    else:
        tile = int(tile_hw)
    assert tile % 128 == 0 and HW_pad % tile == 0
    n_tiles = HW_pad // tile

    # Pass 1: per-channel spatial sums, accumulated across HW tiles.
    sums = pl.pallas_call(
        _se_sum_kernel,
        out_shape=jax.ShapeDtypeStruct((B, C, 1), jnp.float32),
        grid_spec=pltpu.PrefetchScalarGridSpec(
            num_scalar_prefetch=0,
            grid=(B, n_tiles),
            in_specs=[pl.BlockSpec((1, C, tile), lambda b, t: (b, 0, t))],
            out_specs=pl.BlockSpec((1, C, 1), lambda b, t: (b, 0, 0)),
        ),
        compiler_params=pltpu.CompilerParams(
            dimension_semantics=("parallel", "arbitrary"),
            vmem_limit_bytes=vmem_limit),
    )(x)

    # Excitation FCs stay in XLA: negligible FLOPs, and running them in-kernel
    # would leave the MXU >99% idle for no benefit.
    y = sums[:, :, 0] * (1.0 / hw_true)                       # (B, C) f32
    h = jnp.maximum(y @ w1, 0.0)
    s = jax.nn.sigmoid(h @ w2)[:, :, None]                    # (B, C, 1) f32

    # Pass 2: elementwise scale, fully parallel over (B, HW tiles) -> keeps
    # both v7x TensorCores busy even when B == 1.
    return pl.pallas_call(
        _se_scale_kernel,
        out_shape=jax.ShapeDtypeStruct((B, C, HW_pad), x.dtype),
        grid_spec=pltpu.PrefetchScalarGridSpec(
            num_scalar_prefetch=0,
            grid=(B, n_tiles),
            in_specs=[pl.BlockSpec((1, C, tile), lambda b, t: (b, 0, t)),
                      pl.BlockSpec((1, C, 1), lambda b, t: (b, 0, 0))],
            out_specs=pl.BlockSpec((1, C, tile), lambda b, t: (b, 0, t)),
        ),
        compiler_params=pltpu.CompilerParams(
            dimension_semantics=("parallel", "parallel"),
            vmem_limit_bytes=vmem_limit),
    )(x, s)


# ---------------------------------------------------------------------------
# Public wrapper.
# ---------------------------------------------------------------------------
def se_block(x_nchw, w1, w2, *, force_tiled=False, tile_hw=None):
    """SEBlock forward.

    x_nchw: (B, C, H, W) float32 or bfloat16.
    w1 = fc[0].weight.T with shape (C, C//r); w2 = fc[2].weight.T with shape
    (C//r, C).  Returns (B, C, H, W) in x's dtype.
    """
    B, C, H, W = x_nchw.shape
    HW = H * W
    HW_pad = _round_up(HW, 128)          # lane-dense last dim -> unmasked stores
    itemsize = x_nchw.dtype.itemsize

    w1 = w1.astype(jnp.float32)
    w2 = w2.astype(jnp.float32)

    x = x_nchw.reshape(B, C, HW)
    if HW_pad != HW:
        x = jnp.pad(x, ((0, 0), (0, 0), (0, HW_pad - HW)))

    vmem_limit = _pick_vmem_limit()
    fused_budget = max(vmem_limit - (8 << 20), vmem_limit // 2)
    # The pipeline double-buffers both the (1, C, HW_pad) input AND output.
    fused_bytes = 4 * C * HW_pad * itemsize + 8 * (w1.size + w2.size)

    if (not force_tiled) and fused_bytes <= fused_budget:
        out = _se_fused_call(x, w1, w2, hw_true=HW, vmem_limit=vmem_limit)
    else:
        # ~1.5x HBM traffic, but stays functional when the one-shot block
        # would not fit VMEM (e.g. large C*H*W on v7x's 64 MiB).
        out = _se_tiled_call(x, w1, w2, hw_true=HW, vmem_limit=vmem_limit,
                             tile_hw=tile_hw)

    if HW_pad != HW:
        out = out[:, :, :HW]
    return out.reshape(B, C, H, W)


def _reference(x_nchw, w1, w2):
    y = jnp.mean(x_nchw.astype(jnp.float32), axis=(2, 3))     # (B, C)
    h = jnp.maximum(y @ w1, 0.0)
    s = jax.nn.sigmoid(h @ w2)
    return (x_nchw.astype(jnp.float32) * s[:, :, None, None]).astype(x_nchw.dtype)


if __name__ == "__main__":
    B, C, H, W = 2, 8, 16, 16
    reduction = 4
    Cr = C // reduction

    key = jax.random.PRNGKey(0)
    kx, k1, k2, kx2 = jax.random.split(key, 4)

    x = jax.random.normal(kx, (B, C, H, W), dtype=jnp.float32)
    # PyTorch nn.Linear stores (out, in); we store the transposed (in, out).
    w1 = jax.random.normal(k1, (C, Cr), dtype=jnp.float32) * 0.3   # fc[0].weight.T
    w2 = jax.random.normal(k2, (Cr, C), dtype=jnp.float32) * 0.3   # fc[2].weight.T

    # Case 1: fused single-pass path (HW = 256 is already a multiple of 128).
    out = jax.block_until_ready(se_block(x, w1, w2))
    ref = _reference(x, w1, w2)
    assert out.shape == (B, C, H, W)
    assert jnp.allclose(out, ref, atol=1e-5, rtol=1e-5)

    # Case 2: non-multiple-of-128 spatial size -> wrapper pads the lane axis.
    x2 = jax.random.normal(kx2, (B, C, 10, 10), dtype=jnp.float32)
    out2 = jax.block_until_ready(se_block(x2, w1, w2))
    ref2 = _reference(x2, w1, w2)
    assert jnp.allclose(out2, ref2, atol=1e-5, rtol=1e-5)

    # Case 3: force the tiled two-pass fallback (the path used when the
    # per-batch block would not fit VMEM, e.g. on v7x's 64 MiB).
    out3 = jax.block_until_ready(se_block(x, w1, w2, force_tiled=True, tile_hw=128))
    assert jnp.allclose(out3, ref, atol=1e-5, rtol=1e-5)

    print("KERNEL_OK")
</pallas_src>

<mosaic_0001>
module attributes {stable_mosaic.version = 11 : i64} {
  func.func @_se_fused_kernel(%arg0: i32, %arg1: memref<1x8x256xf32, #tpu.memory_space<vmem>>, %arg2: memref<8x2xf32, #tpu.memory_space<vmem>>, %arg3: memref<2x8xf32, #tpu.memory_space<vmem>>, %arg4: memref<1x8x256xf32, #tpu.memory_space<vmem>>) attributes {dimension_semantics = [#tpu.dimension_semantics<parallel>], iteration_bounds = array<i64: 2>, scalar_prefetch = 0 : i64, scratch_operands = 0 : i64, tpu.core_type = #tpu.core_type<tc>, window_params = [{transform_indices = @transform_0, window_bounds = array<i64: 1, 8, 256>}, {pipeline_mode = #tpu.pipeline_mode<synchronous>, transform_indices = @transform_1, window_bounds = array<i64: 8, 2>}, {pipeline_mode = #tpu.pipeline_mode<synchronous>, transform_indices = @transform_2, window_bounds = array<i64: 2, 8>}, {transform_indices = @transform_3, window_bounds = array<i64: 1, 8, 256>}]} {
    %cst = arith.constant 0.000000e+00 : f32
    %0 = vector.broadcast %cst : f32 to vector<1x8xf32>
    %c0_i32 = arith.constant 0 : i32
    %c256_i32 = arith.constant 256 : i32
    %1 = arith.muli %c0_i32, %c256_i32 : i32
    %2 = tpu.assume_multiple %1, 256 : i32
    %c0 = arith.constant 0 : index
    %c0_0 = arith.constant 0 : index
    %3 = arith.index_cast %2 : i32 to index
    %4 = vector.load %arg1[%c0, %c0_0, %3] : memref<1x8x256xf32, #tpu.memory_space<vmem>>, vector<1x8x256xf32>
    %cst_1 = arith.constant dense<0.000000e+00> : vector<1x8xf32>
    %5 = vector.multi_reduction <add>, %4, %cst_1 [2] : vector<1x8x256xf32> to vector<1x8xf32>
    %6 = arith.addf %0, %5 : vector<1x8xf32>
    %c1_i32 = arith.constant 1 : i32
    %cst_2 = arith.constant 3.906250e-03 : f32
    %7 = vector.broadcast %cst_2 : f32 to vector<1x8xf32>
    %8 = arith.mulf %6, %7 : vector<1x8xf32>
    %c0_3 = arith.constant 0 : index
    %c0_4 = arith.constant 0 : index
    %9 = vector.load %arg2[%c0_3, %c0_4] : memref<8x2xf32, #tpu.memory_space<vmem>>, vector<8x2xf32>
    %cst_5 = arith.constant dense<0.000000e+00> : vector<1x2xf32>
    %10 = tpu.matmul %8, %9, %cst_5 {dimension_numbers = #tpu.dot_dimension_numbers<[1], [0], [0], [1], [0, 0, 1, 1], [], []>} : vector<1x8xf32>, vector<8x2xf32>, vector<1x2xf32> -> vector<1x2xf32>
    %cst_6 = arith.constant 0.000000e+00 : f32
    %11 = vector.broadcast %cst_6 : f32 to vector<1x2xf32>
    %12 = arith.maximumf %10, %11 : vector<1x2xf32>
    %c0_7 = arith.constant 0 : index
    %c0_8 = arith.constant 0 : index
    %13 = vector.load %arg3[%c0_7, %c0_8] : memref<2x8xf32, #tpu.memory_space<vmem>>, vector<2x8xf32>
    %cst_9 = arith.constant dense<0.000000e+00> : vector<1x8xf32>
    %14 = tpu.matmul %12, %13, %cst_9 {dimension_numbers = #tpu.dot_dimension_numbers<[1], [0], [0], [1], [0, 0, 1, 1], [], []>} : vector<1x2xf32>, vector<2x8xf32>, vector<1x8xf32> -> vector<1x8xf32>
    %15 = arith.negf %14 : vector<1x8xf32>
    %16 = math.exp %15 : vector<1x8xf32>
    %cst_10 = arith.constant 1.000000e+00 : f32
    %17 = vector.broadcast %cst_10 : f32 to vector<1x8xf32>
    %18 = arith.addf %17, %16 : vector<1x8xf32>
    %19 = arith.divf %17, %18 : vector<1x8xf32>
    %c0_i32_11 = arith.constant 0 : i32
    %c256_i32_12 = arith.constant 256 : i32
    %20 = arith.muli %c0_i32_11, %c256_i32_12 : i32
    %21 = tpu.assume_multiple %20, 256 : i32
    %c0_13 = arith.constant 0 : index
    %c0_14 = arith.constant 0 : index
    %22 = arith.index_cast %21 : i32 to index
    %23 = vector.load %arg1[%c0_13, %c0_14, %22] : memref<1x8x256xf32, #tpu.memory_space<vmem>>, vector<1x8x256xf32>
    %24 = vector.shape_cast %19 : vector<1x8xf32> to vector<1x8x1xf32>
    %25 = vector.broadcast %24 : vector<1x8x1xf32> to vector<1x8x256xf32>
    %26 = arith.mulf %23, %25 : vector<1x8x256xf32>
    %c0_15 = arith.constant 0 : index
    %c0_16 = arith.constant 0 : index
    %27 = arith.index_cast %21 : i32 to index
    %28 = vector.load %arg4[%c0_15, %c0_16, %27] : memref<1x8x256xf32, #tpu.memory_space<vmem>>, vector<1x8x256xf32>
    tpu.vector_store %arg4[%c0_15, %c0_16, %27], %26 {strides = array<i32>} : memref<1x8x256xf32, #tpu.memory_space<vmem>>, vector<1x8x256xf32>,
    %c1_i32_17 = arith.constant 1 : i32
    return
  }
  func.func @transform_0(%arg0: i32) -> (i32, i32, i32) {
    %c0_i32 = arith.constant 0 : i32
    %c0_i32_0 = arith.constant 0 : i32
    %c0_i32_1 = arith.constant 0 : i32
    return %arg0, %c0_i32, %c0_i32_0 : i32, i32, i32
  }
  func.func @transform_1(%arg0: i32) -> (i32, i32) {
    %c0_i32 = arith.constant 0 : i32
    %c0_i32_0 = arith.constant 0 : i32
    %c0_i32_1 = arith.constant 0 : i32
    return %c0_i32, %c0_i32_0 : i32, i32
  }
  func.func @transform_2(%arg0: i32) -> (i32, i32) {
    %c0_i32 = arith.constant 0 : i32
    %c0_i32_0 = arith.constant 0 : i32
    %c0_i32_1 = arith.constant 0 : i32
    return %c0_i32, %c0_i32_0 : i32, i32
  }
  func.func @transform_3(%arg0: i32) -> (i32, i32, i32) {
    %c0_i32 = arith.constant 0 : i32
    %c0_i32_0 = arith.constant 0 : i32
    %c0_i32_1 = arith.constant 0 : i32
    return %arg0, %c0_i32, %c0_i32_0 : i32, i32, i32
  }
}

</mosaic_0001>

<bundles_post_ra>
// kernel: tpu_custom_call.1
= control target key start
LH: loop header
LB: loop body
LE: loop exit
PB: predicated region body
PF: predicated region fallthrough
CT: control target
= control target key end

     0   :  { %8 = vsyncpa [#allocation3], 0  ;;  %s697_s0 = inlined_call_operand.hbm [shape: f32[2,8,256], index: 0, kind: input, shape index: {}]   ;;  %s698_s1 = inlined_call_operand.vmem [shape: f32[8,2], index: 1, kind: input, shape index: {}]   ;;  %s699_s2 = inlined_call_operand.vmem [shape: f32[2,8], index: 2, kind: input, shape index: {}]   ;;  %s700_s3 = inlined_call_operand.hbm [shape: f32[2,8,256], index: 3, kind: output, shape index: {}]  }
   0x1   :  { %10 = vsyncpa [#allocation3 + $0x1], 0 }
   0x2   :  { %11 = vsyncpa [#allocation4], 0 }
   0x3   :  { %13 = vsyncpa [#allocation4 + $0x1], 0  ;;  %s560_s12 = smov 0   ;;  %s562_s13 = smov 0  }
   0x4   :  { %s564_s14 = smov 0   ;;  %s566_s15 = smov 0  }
   0x5 LB: > { %s581_s16 = sadd.s32 4294967295, %s538_s15   ;;  %s371_s17 = sadd.s32 4294967294, %s538_s15   ;;  %s538_s15 = sphi %s566_s15, %s710_s15   ;;  %s534_s14 = sphi %s564_s14, %s709_s14   ;;  %s530_s13 = sphi %s562_s13, %s708_s13   ;;  %s526_s12 = sphi %s560_s12, %s707_s12  }
   0x6   : > { %s585_s18 = sadd.s32 1, %s538_s15   ;;  %s26_s19 = sadd.s32 1, %s534_s14 }
   0x7   : > { %s23_s20 = ssub.s32 %s538_s15, %s585_s18  ;;  %p33_p0 = scmp.ne.s32.totalorder %s534_s14, %s530_s13 }
   0x8   : > { %p24_p1 = scmp.eq.s32.totalorder %s23_s20, 0  ;;  %p34_p2 = scmp.eq.s32.totalorder %s538_s15, 0 }
   0x9   : > { %p39_p3 = scmp.ne.s32.totalorder %s530_s13, %s526_s12  ;;  %p40_p4 = scmp.eq.s32.totalorder %s581_s16, 0 }
   0xa   : > { %s597_s21 = scalar_select %p24_p1, %s534_s14, %s26_s19  }
   0xb   : > { %p599_p5 = por %p34_p2, %p33_p0  ;;  %p603_p6 = por %p40_p4, %p39_p3 }
   0xc   : > { %p105_p7 = scmp.eq.s32.totalorder %s581_s16, 1  ;;  %p111_p8 = scmp.eq.s32.totalorder %s371_s17, 1 }
   0xd   : > { %p403_p10 = scmp.lt.s32.totalorder %s538_s15, 2  ;;  %s137_s26 = sand.u32 1, %s534_s14  }
   0xe   : > { %p610_p11 = por %p105_p7, %p33_p0  ;;  %p614_p12 = por %p111_p8, %p39_p3 }
   0xf   : > { %s389_s27 = sshll.u32 %s538_s15, 4  ;;  %s374_s28 = sshll.u32 %s137_s26, 4 }
  0x10   : > { %s146_s4 = scalar_lea.hbm %s697_s0, %s389_s27  ;;  %s141_s6 = scalar_lea.vmem [#allocation2], %s374_s28 }
  0x11   : > { %s148_s5 = sshll.u32 %s146_s4, 4  ;;  %s150_s7 = sshll.u32 %s141_s6, 4  ;;  %s149_s5 = int_to_ptr.hbm [resolvable:$true] %s148_s5  ;;  %s151_s7 = int_to_ptr.vmem [resolvable:$true] %s150_s7 }
  0x12   : > { %p625_p13 = pnand %p403_p10, %p599_p5  ;;  %p377_p0 = scmp.ge.s32.totalorder %s538_s15, 1 }
  0x13   : > { %p155_p1 = scmp.lt.s32.totalorder %s538_s15, 3  ;;  %s138_s9 = scalar_lea.sflag [#allocation3], %s137_s26 }
  0x14   : > { %s442_s10 = sshra.s32 %s149_s5, 4  ;;  %p446_p3 = pneg %p625_p13  ;;  %s443_s10 = int_to_ptr.hbm [resolvable:$true] %s442_s10 }
  0x15   : > { %s444_s11 = scalar_lea.hbm %s443_s10, 16  ;;  %s449_s20 = scalar_lea.hbm %s697_s0, 32 }
  0x16   : > { %p445_p2 = scmp.ne.s32.totalorder %s443_s10, %s444_s11  ;;  %p450_p5 = scmp.lt.s32.totalorder %s443_s10, %s697_s0 }
  0x17   : > { %p451_p8 = scmp.lt.s32.totalorder %s449_s20, %s444_s11 }
  0x18   : > { %p447_p4 = pnand %p446_p3, %p445_p2 }
  0x19   : > { %p452_p10 = por %p451_p8, %p450_p5 }
  0x1a   : > { %p448_p7 = pneg %p447_p4 }
  0x1c   : > { %p453_p9 = pnand %p452_p10, %p448_p7 }
  0x1e   : > { %456 = shalt.err (!%p453_p9)
}
  0x1f   : > { %398 = dma.hbm_to_vmem [thread:$0]  (!%p625_p13), %s149_s5, 256, %s151_s7, %s138_s9  }
  0x20   : > { %p156_p2 = pnand %p377_p0, %p155_p1 }
  0x21   : > { %s646_s26 = sand.u32 (!%p156_p2), 1, %s530_s13  }
  0x22   : > { %159 = sbr.rel (%p156_p2) target bundleno = 568 (0x238), region = 32  ;;  %s378_s28 = sshll.u32 (!%p156_p2), %s646_s26, 4 }
  0x23   : > { %s162_s29 = scalar_lea.sflag (!%p156_p2), [#allocation3], %s646_s26  ;;  %s165_s30 = scalar_lea.vmem (!%p156_p2), [#allocation2], %s378_s28 }
  0x27   : > { %517 = dma.done.wait (%p603_p6), %s162_s29, 256  }
  0x28   : > { %519 = vsyncadd (%p603_p6), %s162_s29, 4294967040  ;;  %v189_v0 = vld [vmem:[%s165_s30] sm:$0xff]  ;;  %v190_v1 = vld [vmem:[%s165_s30 + $0x8] sm:$0xff]  ;;  %v198_v4 = vlaneseq  ;;  %vm201_vm0 = vcmask 64512   ;;  %vm230_vm1 = vcmask 1041408   ;;  %vm226_vm2 = vcmask 15360  }
  0x29   : > { %v191_v2 = vadd.f32 %v190_v1, %v189_v0  ;;  %v196_v3 = vld [vmem:[%s698_s1] sm:$0xff]  ;;  %s390_s23 = sshll.u32 %s581_s16, 4  ;;  %s188_s11 = scalar_lea.vmem [#allocation5], %s378_s28 }
  0x2a   : > { %219 = vmatpush.msra.mxu0 %v196_v3  ;;  %v199_v5 = vand.u32 127, %v198_v4  ;;  %v225_v9 = vld [vmem:[%s699_s2] sm:$0x3]  ;;  %v275_v12 = vshrl.u32 %v198_v4, 7  ;;  %s296_s10 = scalar_lea.hbm %s700_s3, %s390_s23  ;;  %s298_s17 = sshll.u32 %s188_s11, 4  ;;  %s299_s17 = int_to_ptr.vmem [resolvable:$true] %s298_s17 }
  0x2b   : > { %192 = vadd.xlane.f32.xlu0 %v191_v2  ;;  %381 = vmatpush.msk.msra.mxu1 %vm230_vm1, %v225_v9  ;;  %s300_s19 = sshll.u32 %s296_s10, 4  ;;  %s285_s20 = scalar_lea.sflag [#allocation4], %s646_s26  ;;  %s301_s19 = int_to_ptr.hbm [resolvable:$true] %s300_s19 }
  0x2c   : > { %437 = vset.pattern.permute.xlu0 %v275_v12  ;;  %s486_s22 = sshra.s32 %s301_s19, 4  ;;  %s492_s28 = scalar_lea.hbm %s700_s3, 32  ;;  %s487_s22 = int_to_ptr.hbm [resolvable:$true] %s486_s22 }
  0x2d   : > { %s488_s16 = scalar_lea.hbm %s487_s22, 16  ;;  %p493_p0 = scmp.lt.s32.totalorder %s487_s22, %s700_s3 }
  0x2e   : > { %p489_p6 = scmp.ne.s32.totalorder %s487_s22, %s488_s16  ;;  %p494_p1 = scmp.lt.s32.totalorder %s492_s28, %s488_s16 }
  0x30   : > { %p490_p9 = pnand %p489_p6, %p610_p11  ;;  %p495_p3 = por %p494_p1, %p493_p0 }
  0x32   : > { %p491_p13 = pneg %p490_p9 }
  0x34   : > { %p496_p4 = pnand %p495_p3, %p491_p13 }
  0x9e   : > { %v193_v6 = vpop.xlane.xlu0 %192 }
  0x9f   : > { %v195_v7 = vmul.f32 0.00390625, %v193_v6 }
  0xa1   : > { %v200_v8 = vperm.slane %v195_v7, %v199_v5 }
  0xa3   : > { %380 = vmatmul.msk.f32.vlgmr.msra.gmra.mxu0 %vm201_vm0, %v200_v8 }
 0x120   : > { %v221_v10 = vpop.f32.mrf.mxu0 }
 0x121   : > { %v224_v11 = vmax.f32 %v221_v10, 0.0 }
 0x123   : > { %382 = vmatmul.msk.f32.vlgmr.msra.gmra.mxu1 %vm226_vm2, %v224_v11 }
 0x1a0   : > { %v251_v13 = vpop.f32.mrf.mxu1 }
 0x1a1   : > { %v383_v14 = vmul.f32 -1.442695, %v251_v13 }
 0x1a3   : > { %438 = vpow2.f32 %v383_v14 }
 0x1a9   : > { %v439_v15 = vpop.eup %438 }
 0x1aa   : > { %v257_v16 = vadd.f32 1.0, %v439_v15 }
 0x1ac   : > { %440 = vrcp.f32 %v257_v16  ;;  %v269_v20 = vand.u32 2147483648, %v257_v16  ;;  %v267_v22 = vand.u32 2147483647, %v257_v16  ;;  %vm263_vm4 = vweird.f32 %v257_v16 }
 0x1ae   : > { %v270_v24 = vor.u32 1.1754944e-38, %v269_v20  ;;  %vm268_vm6 = vcmp.eq.f32.partialorder %v267_v22, 8.507059e+37 }
 0x1b2   : > { %v441_v17 = vpop.eup %440 }
 0x1b3   : > { %v259_v18 = vmul.f32 %v441_v17, %v257_v16  ;;  %vm264_vm3 = vweird.f32 %v441_v17 }
 0x1b4   : > { %vm265_vm5 = vmor %vm263_vm4, %vm264_vm3 }
 0x1b5   : > { %v260_v19 = vsub.f32 1.0, %v259_v18 }
 0x1b7   : > { %v261_v21 = vmul.f32 %v441_v17, %v260_v19 }
 0x1b9   : > { %v262_v23 = vadd.f32 %v441_v17, %v261_v21 }
 0x1bb   : > { %v266_v25 = vsel %vm265_vm5, %v441_v17, %v262_v23 }
 0x1bc   : > { %v271_v26 = vsel %vm268_vm6, %v270_v24, %v266_v25 }
 0x1bd   : > { %v273_v27 = vperm.slane %v271_v26, 0 }
 0x1bf   : > { %278 = vperm.xlu0 %437, %v273_v27  }
 0x231   : > { %v279_v28 = vpop.permute.xlu0 %278 }
 0x232   : > { %v280_v29 = vmul.f32 %v279_v28, %v189_v0  ;;  %v281_v30 = vmul.f32 %v279_v28, %v190_v1 }
 0x234   : > { %282 = vst [vmem:[%s188_s11] sm:$0xff] %v280_v29 }
 0x235   : > { %283 = vst [vmem:[%s188_s11 + $0x8] sm:$0xff] %v281_v30 }
 0x236   : > { %499 = shalt.err (!%p496_p4)
}
 0x237   : > { %393 = dma.vmem_to_hbm [thread:$0]  (%p610_p11), %s299_s17, 256, %s301_s19, %s285_s20  }
 0x238 PF: > { %s312_s26 = sand.u32 1, %s526_s12   ;;  %p706_p7 = scmp.ge.s32.totalorder %s538_s15, 2 }
 0x239   : > { %s313_s5 = scalar_lea.sflag [#allocation4], %s312_s26 }
 0x23a   : > { %p400_p5 = pnand %p706_p7, %p614_p12 }
 0x23c   : > { %p401_p8 = pneg %p400_p5 }
 0x23e   : > { %521 = dma.done.wait (%p401_p8), %s313_s5, 256  }
 0x23f   : > { %523 = vsyncadd (%p401_p8), %s313_s5, 4294967040  ;;  %p16_p10 = scmp.ge.s32.totalorder %s585_s18, 4   ;;  %s707_s12 = smov %s530_s13 }
 0x240   : > { %s708_s13 = smov %s534_s14  ;;  %s709_s14 = smov %s597_s21 }
 0x241   : > { %s710_s15 = smov %s585_s18  ;;  %18 = sbr.rel (!%p16_p10) target bundleno = 5 (0x5), region = 77 }
 0x246   :  { %319 = vsyncpa [#allocation3], 1 }
 0x247   :  { %321 = vsyncpa [#allocation3 + $0x1], 1 }
 0x248   :  { %322 = vsyncpa [#allocation4], 1 }
 0x249   :  { %324 = vsyncpa [#allocation4 + $0x1], 1 }

</bundles_post_ra>
